<compile_context>
chip_gen: v5e
topology: v5e:2x2
jax: 0.10.0
libtpu: 0.0.40
codegen_flags: <defaults>
</compile_context>

<pallas_src>
import functools

import jax
import jax.numpy as jnp
from jax.experimental import pallas as pl
from jax.experimental.pallas import tpu as pltpu

OUT_LANES = 128  # lane-dense output width


def policy_kernel(x_ref, w1_ref, w2c_ref, b2c_ref, out_ref, *, num_actions):
    # shared_features: Linear (+bias folded into the weight) + ReLU.
    h = jnp.maximum(
        jnp.dot(x_ref[...], w1_ref[...], preferred_element_type=jnp.float32), 0.0)

    # Fused actor+critic head, already padded to 128 lanes:
    #   lanes [0, A)      -> actor logits
    #   lane  A           -> critic state value
    #   lanes (A, 128)    -> zero weight columns (ignored)
    combined = jnp.dot(h, w2c_ref[...], preferred_element_type=jnp.float32) + b2c_ref[...]

    lane = jax.lax.broadcasted_iota(jnp.int32, combined.shape, 1)
    is_actor = lane < num_actions

    # Numerically stable softmax restricted to the actor lanes (exact division:
    # the probabilities feed a categorical sampler / log-prob downstream).
    masked = jnp.where(is_actor, combined, -1e30)
    m = jnp.max(masked, axis=-1, keepdims=True)
    e = jnp.exp(masked - m)                      # pad lanes underflow to 0
    denom = jnp.sum(e, axis=-1, keepdims=True)
    probs_full = e / denom                       # lanes >= A are exactly 0

    # Lane-dense store: probs in lanes < A, raw value in lane A, zeros elsewhere.
    out_ref[...] = jnp.where(lane == num_actions, combined, probs_full)


def base_policy_reinforce_with_baseline_forward(x, w1_t, b1, w2_t, b2, wc_t, bc,
                                                *, max_rows_per_step=1024):
    """x: (B, D_in) f32; w1_t: (D_in, H); b1: (H,) or (1, H); w2_t: (H, A);
    b2: (A,) or (1, A); wc_t: (H, 1); bc: (1,) or (1, 1).
    Returns (probs (B, A), state_values (B, 1))."""
    B, D_in = x.shape
    H = w1_t.shape[1]
    A = w2_t.shape[1]
    assert A + 1 <= OUT_LANES

    # Fold b1 into W1 via a ones column on x: one fewer input stream.
    x_aug = jnp.concatenate([x, jnp.ones((B, 1), x.dtype)], axis=1)       # (B, D_in+1)
    w1_aug = jnp.concatenate([w1_t, jnp.reshape(b1, (1, H))], axis=0)     # (D_in+1, H)

    # Fuse actor + critic heads and pad to a lane-dense 128-wide head.
    w2c = jnp.concatenate([w2_t, wc_t], axis=1)                           # (H, A+1)
    w2c = jnp.pad(w2c, ((0, 0), (0, OUT_LANES - (A + 1))))                # (H, 128)
    b2c = jnp.concatenate(
        [jnp.reshape(b2, (1, A)), jnp.reshape(bc, (1, 1))], axis=1)
    b2c = jnp.pad(b2c, ((0, 0), (0, OUT_LANES - (A + 1))))                # (1, 128)

    # Single grid step for small batches (footprint << VMEM); tile only when huge.
    Bp8 = ((B + 7) // 8) * 8
    tb = Bp8 if Bp8 <= max_rows_per_step else max_rows_per_step
    Bp = ((B + tb - 1) // tb) * tb
    if Bp != B:
        x_aug = jnp.pad(x_aug, ((0, Bp - B), (0, 0)))

    K = D_in + 1
    grid = (Bp // tb,)
    flops = 2 * Bp * (K * H + H * OUT_LANES)
    bytes_accessed = 4 * (Bp * K + K * H + H * OUT_LANES + OUT_LANES + Bp * OUT_LANES)

    out = pl.pallas_call(
        functools.partial(policy_kernel, num_actions=A),
        out_shape=jax.ShapeDtypeStruct((Bp, OUT_LANES), jnp.float32),
        grid=grid,
        in_specs=[
            # activation stream: tiled over the batch
            pl.BlockSpec((tb, K), lambda i: (i, 0)),
            # weights / biases: same block every step -> VMEM-resident
            pl.BlockSpec((K, H), lambda i: (0, 0)),
            pl.BlockSpec((H, OUT_LANES), lambda i: (0, 0)),
            pl.BlockSpec((1, OUT_LANES), lambda i: (0, 0)),
        ],
        out_specs=pl.BlockSpec((tb, OUT_LANES), lambda i: (i, 0)),
        compiler_params=pltpu.CompilerParams(
            # batch axis is fully independent -> megacore-shardable when grid > 1
            dimension_semantics=("parallel",),
        ),
        cost_estimate=pl.CostEstimate(
            flops=flops, transcendentals=Bp * OUT_LANES, bytes_accessed=bytes_accessed),
    )(x_aug, w1_aug, w2c, b2c)

    probs = out[:B, :A]
    values = out[:B, A:A + 1]
    return probs, values


def xavier_uniform(key, fan_in, fan_out):
    # torch.nn.init.xavier_uniform on a (fan_out, fan_in) weight
    limit = (6.0 / (fan_in + fan_out)) ** 0.5
    return jax.random.uniform(
        key, (fan_out, fan_in), dtype=jnp.float32, minval=-limit, maxval=limit)


if __name__ == "__main__":
    # Module config: input_size=16 with is_self_play=True -> D_in=32,
    # shared_features_size=32, num_actions=8.  Small batch of stacked states.
    B, D_in, H, A = 16, 32, 32, 8

    key = jax.random.PRNGKey(0)
    k_x, k_w1, k_b1, k_w2, k_b2, k_wc, k_bc = jax.random.split(key, 7)

    x = jax.random.normal(k_x, (B, D_in), dtype=jnp.float32)

    # shared_features: nn.Linear(D_in, H), xavier_uniform weights (torch layout)
    w1 = xavier_uniform(k_w1, D_in, H)                        # (H, D_in)
    b1 = jax.random.normal(k_b1, (H,), dtype=jnp.float32) * 0.01
    # actor: nn.Linear(H, A)
    w2 = xavier_uniform(k_w2, H, A)                           # (A, H)
    b2 = jax.random.normal(k_b2, (A,), dtype=jnp.float32) * 0.01
    # critic: nn.Linear(H, 1)
    wc = xavier_uniform(k_wc, H, 1)                           # (1, H)
    bc = jax.random.normal(k_bc, (1,), dtype=jnp.float32) * 0.01

    # Pre-transpose weights to kernel layout.
    probs, values = base_policy_reinforce_with_baseline_forward(
        x, w1.T, b1, w2.T, b2, wc.T, bc)
    probs, values = jax.block_until_ready((probs, values))

    # Reference check in plain JAX
    h_ref = jnp.maximum(x @ w1.T + b1, 0.0)
    probs_ref = jax.nn.softmax(h_ref @ w2.T + b2, axis=1)
    values_ref = h_ref @ wc.T + bc

    assert probs.shape == (B, A) and values.shape == (B, 1)
    assert jnp.allclose(probs, probs_ref, atol=2e-3, rtol=2e-3)
    assert jnp.allclose(jnp.sum(probs, axis=1), 1.0, atol=1e-5)
    assert jnp.allclose(values, values_ref, atol=2e-3, rtol=2e-3)

    print("KERNEL_OK")
</pallas_src>

<mosaic_0001>
module attributes {stable_mosaic.version = 11 : i64} {
  func.func @policy_kernel(%arg0: i32, %arg1: memref<16x33xf32, #tpu.memory_space<vmem>>, %arg2: memref<33x32xf32, #tpu.memory_space<vmem>>, %arg3: memref<32x128xf32, #tpu.memory_space<vmem>>, %arg4: memref<1x128xf32, #tpu.memory_space<vmem>>, %arg5: memref<16x128xf32, #tpu.memory_space<vmem>>) attributes {dimension_semantics = [#tpu.dimension_semantics<parallel>], iteration_bounds = array<i64: 1>, scalar_prefetch = 0 : i64, scratch_operands = 0 : i64, tpu.core_type = #tpu.core_type<tc>, window_params = [{transform_indices = @transform_0, window_bounds = array<i64: 16, 33>}, {pipeline_mode = #tpu.pipeline_mode<synchronous>, transform_indices = @transform_1, window_bounds = array<i64: 33, 32>}, {pipeline_mode = #tpu.pipeline_mode<synchronous>, transform_indices = @transform_2, window_bounds = array<i64: 32, 128>}, {pipeline_mode = #tpu.pipeline_mode<synchronous>, transform_indices = @transform_3, window_bounds = array<i64: 1, 128>}, {transform_indices = @transform_4, window_bounds = array<i64: 16, 128>}]} {
    %c0 = arith.constant 0 : index
    %c0_0 = arith.constant 0 : index
    %0 = vector.load %arg1[%c0, %c0_0] : memref<16x33xf32, #tpu.memory_space<vmem>>, vector<16x33xf32>
    %c0_1 = arith.constant 0 : index
    %c0_2 = arith.constant 0 : index
    %1 = vector.load %arg2[%c0_1, %c0_2] : memref<33x32xf32, #tpu.memory_space<vmem>>, vector<33x32xf32>
    %cst = arith.constant dense<0.000000e+00> : vector<16x32xf32>
    %2 = tpu.matmul %0, %1, %cst {dimension_numbers = #tpu.dot_dimension_numbers<[1], [0], [0], [1], [0, 0, 1, 1], [], []>} : vector<16x33xf32>, vector<33x32xf32>, vector<16x32xf32> -> vector<16x32xf32>
    %cst_3 = arith.constant 0.000000e+00 : f32
    %3 = vector.broadcast %cst_3 : f32 to vector<16x32xf32>
    %4 = arith.maximumf %2, %3 : vector<16x32xf32>
    %c0_4 = arith.constant 0 : index
    %c0_5 = arith.constant 0 : index
    %5 = vector.load %arg3[%c0_4, %c0_5] : memref<32x128xf32, #tpu.memory_space<vmem>>, vector<32x128xf32>
    %cst_6 = arith.constant dense<0.000000e+00> : vector<16x128xf32>
    %6 = tpu.matmul %4, %5, %cst_6 {dimension_numbers = #tpu.dot_dimension_numbers<[1], [0], [0], [1], [0, 0, 1, 1], [], []>} : vector<16x32xf32>, vector<32x128xf32>, vector<16x128xf32> -> vector<16x128xf32>
    %c0_7 = arith.constant 0 : index
    %c0_8 = arith.constant 0 : index
    %7 = vector.load %arg4[%c0_7, %c0_8] : memref<1x128xf32, #tpu.memory_space<vmem>>, vector<1x128xf32>
    %8 = vector.broadcast %7 : vector<1x128xf32> to vector<16x128xf32>
    %9 = arith.addf %6, %8 : vector<16x128xf32>
    %10 = tpu.iota {dimensions = array<i32: 1>} : vector<16x128xi32>
    %c8_i32 = arith.constant 8 : i32
    %11 = vector.broadcast %c8_i32 : i32 to vector<16x128xi32>
    %12 = arith.cmpi slt, %10, %11 : vector<16x128xi32>
    %cst_9 = arith.constant -1.000000e+30 : f32
    %13 = vector.broadcast %cst_9 : f32 to vector<16x128xf32>
    %14 = arith.select %12, %9, %13 : vector<16x128xi1>, vector<16x128xf32>
    %cst_10 = arith.constant dense<0xFF800000> : vector<16xf32>
    %15 = vector.multi_reduction <maximumf>, %14, %cst_10 [1] : vector<16x128xf32> to vector<16xf32>
    %16 = vector.shape_cast %15 : vector<16xf32> to vector<16x1xf32>
    %17 = vector.broadcast %16 : vector<16x1xf32> to vector<16x128xf32>
    %18 = arith.subf %14, %17 : vector<16x128xf32>
    %19 = math.exp %18 : vector<16x128xf32>
    %cst_11 = arith.constant dense<0.000000e+00> : vector<16xf32>
    %20 = vector.multi_reduction <add>, %19, %cst_11 [1] : vector<16x128xf32> to vector<16xf32>
    %21 = vector.shape_cast %20 : vector<16xf32> to vector<16x1xf32>
    %22 = vector.broadcast %21 : vector<16x1xf32> to vector<16x128xf32>
    %23 = arith.divf %19, %22 : vector<16x128xf32>
    %c8_i32_12 = arith.constant 8 : i32
    %24 = vector.broadcast %c8_i32_12 : i32 to vector<16x128xi32>
    %25 = arith.cmpi eq, %10, %24 : vector<16x128xi32>
    %26 = arith.select %25, %9, %23 : vector<16x128xi1>, vector<16x128xf32>
    %c0_13 = arith.constant 0 : index
    %c0_14 = arith.constant 0 : index
    %27 = vector.load %arg5[%c0_13, %c0_14] : memref<16x128xf32, #tpu.memory_space<vmem>>, vector<16x128xf32>
    tpu.vector_store %arg5[%c0_13, %c0_14], %26 {strides = array<i32>} : memref<16x128xf32, #tpu.memory_space<vmem>>, vector<16x128xf32>,
    return
  }
  func.func @transform_0(%arg0: i32) -> (i32, i32) {
    %c0_i32 = arith.constant 0 : i32
    %c0_i32_0 = arith.constant 0 : i32
    return %arg0, %c0_i32 : i32, i32
  }
  func.func @transform_1(%arg0: i32) -> (i32, i32) {
    %c0_i32 = arith.constant 0 : i32
    %c0_i32_0 = arith.constant 0 : i32
    %c0_i32_1 = arith.constant 0 : i32
    return %c0_i32, %c0_i32_0 : i32, i32
  }
  func.func @transform_2(%arg0: i32) -> (i32, i32) {
    %c0_i32 = arith.constant 0 : i32
    %c0_i32_0 = arith.constant 0 : i32
    %c0_i32_1 = arith.constant 0 : i32
    return %c0_i32, %c0_i32_0 : i32, i32
  }
  func.func @transform_3(%arg0: i32) -> (i32, i32) {
    %c0_i32 = arith.constant 0 : i32
    %c0_i32_0 = arith.constant 0 : i32
    %c0_i32_1 = arith.constant 0 : i32
    return %c0_i32, %c0_i32_0 : i32, i32
  }
  func.func @transform_4(%arg0: i32) -> (i32, i32) {
    %c0_i32 = arith.constant 0 : i32
    %c0_i32_0 = arith.constant 0 : i32
    return %arg0, %c0_i32 : i32, i32
  }
}

</mosaic_0001>

<bundles_post_ra>
// kernel: tpu_custom_call.1
= control target key start
LH: loop header
LB: loop body
LE: loop exit
PB: predicated region body
PF: predicated region fallthrough
CT: control target
= control target key end

     0   :  { %vm32_vm0 = vcmask 1040384   ;;  %s298_s0 = inlined_call_operand.vmem [shape: f32[16,33], index: 0, kind: input, shape index: {}]   ;;  %s299_s1 = inlined_call_operand.vmem [shape: f32[33,32], index: 1, kind: input, shape index: {}]   ;;  %s300_s2 = inlined_call_operand.vmem [shape: f32[32,128], index: 2, kind: input, shape index: {}]   ;;  %s301_s3 = inlined_call_operand.vmem [shape: f32[1,128], index: 3, kind: input, shape index: {}]   ;;  %s302_s4 = inlined_call_operand.hbm [shape: f32[16,128], index: 4, kind: output, shape index: {}]  }
   0x1   :  { %v24_v0 = vld [vmem:[%s299_s1 + $0x20] sm:$0x1]  ;;  %v23_v1 = vld [vmem:[%s299_s1 + $0x18] sm:$0xff]  ;;  %v22_v2 = vld [vmem:[%s299_s1 + $0x10] sm:$0xff] }
   0x2   :  { %171 = vmatpush.msk.msra.mxu0 %vm32_vm0, %v24_v0  ;;  %176 = vmatpush.msk.msra.mxu2 %vm32_vm0, %v24_v0  ;;  %v64_v3 = vld [vmem:[%s300_s2 + $0x18] sm:$0xff]  ;;  %v63_v4 = vld [vmem:[%s300_s2 + $0x10] sm:$0xff] }
   0x4   :  { %48 = vmatpush.msra.mxu0 %v23_v1  ;;  %177 = vmatpush.msra.mxu2 %v23_v1 }
   0x5   :  { %9 = vsyncpa [#allocation3], 0  ;;  %v21_v5 = vld [vmem:[%s299_s1 + $0x8] sm:$0xff]  ;;  %88 = vmatpush.msra.mxu1 %v64_v3  ;;  %181 = vmatpush.msra.mxu3 %v64_v3  ;;  %v20_v6 = vld [vmem:[%s299_s1] sm:$0xff]  ;;  %vm25_vm1 = vcmask 269312   ;;  %vm69_vm2 = vcmask 261120   ;;  %v99_v15 = vlaneseq }
   0x6   :  { %49 = vmatpush.msra.mxu0 %v22_v2  ;;  %178 = vmatpush.msra.mxu2 %v22_v2  ;;  %v18_v7 = vld [vmem:[%s298_s0] sm:$0xff]  ;;  %v19_v8 = vld [vmem:[%s298_s0 + $0x8] sm:$0xff]  ;;  %s159_s13 = sshll.u32 %s302_s4, 4  ;;  %s224_s14 = smov 128   ;;  %s160_s13 = int_to_ptr.hbm [resolvable:$true] %s159_s13 }
   0x7   :  { %89 = vmatpush.msra.mxu1 %v63_v4  ;;  %182 = vmatpush.msra.mxu3 %v63_v4  ;;  %v62_v9 = vld [vmem:[%s300_s2 + $0x8] sm:$0xff]  ;;  %v61_v10 = vld [vmem:[%s300_s2] sm:$0xff]  ;;  %v284_v16 = vand.u32 127, %v99_v15  ;;  %s223_s2 = smov [#allocation2]   ;;  %s225_s15 = smov 8  }
   0x8   :  { %50 = vmatpush.msra.mxu0 %v21_v5  ;;  %179 = vmatpush.msra.mxu2 %v21_v5  ;;  %v188_v17 = vld [vmem:[%s301_s3] ss:$0 sm:$0xff]  ;;  %s157_s3 = sshll.u32 %s223_s2, 4  ;;  %s158_s3 = int_to_ptr.vmem [resolvable:$true] %s157_s3 }
   0x9   :  { %90 = vmatpush.msra.mxu1 %v62_v9  ;;  %183 = vmatpush.msra.mxu3 %v62_v9  ;;  %vm101_vm3 = vcmp.lt.s32.totalorder %v284_v16, 8  ;;  %vm148_vm8 = vcmp.eq.s32.totalorder %v284_v16, 8 }
   0xa   :  { %51 = vmatpush.msra.mxu0 %v20_v6  ;;  %180 = vmatpush.msra.mxu2 %v20_v6 }
   0xb   :  { %172 = vmatmul.msk.f32.vlgmr.msra.gmra.mxu0 %vm25_vm1, %v18_v7  ;;  %173 = vmatmul.msk.f32.vlgmr.msra.gmra.mxu2 %vm25_vm1, %v19_v8 }
   0xc   :  { %91 = vmatpush.msra.mxu1 %v61_v10  ;;  %184 = vmatpush.msra.mxu3 %v61_v10 }
  0x88   :  { %v53_v11 = vpop.f32.mrf.mxu0 }
  0x89   :  { %v59_v12 = vmax.f32 %v53_v11, 0.0 }
  0x8b   :  { %174 = vmatmul.msk.f32.vlgmr.msra.gmra.mxu1 %vm69_vm2, %v59_v12 }
  0x8e   :  { %v56_v13 = vpop.f32.mrf.mxu2 }
  0x8f   :  { %v60_v14 = vmax.f32 %v56_v13, 0.0 }
  0x91   :  { %175 = vmatmul.msk.f32.vlgmr.msra.gmra.mxu3 %vm69_vm2, %v60_v14 }
 0x108   :  { %v93_v18 = vpop.f32.mrf.mxu1 }
 0x109   :  { %v94_v19 = vadd.f32 %v188_v17, %v93_v18 }
 0x10b   :  { %v102_v20 = vsel %vm101_vm3, %v94_v19, -1e+30 }
 0x10c   :  { %104 = vmax.xlane.f32.xlu0 %v102_v20 }
 0x114   :  { %v96_v21 = vpop.f32.mrf.mxu3 }
 0x115   :  { %v97_v22 = vadd.f32 %v188_v17, %v96_v21 }
 0x117   :  { %v103_v23 = vsel %vm101_vm3, %v97_v22, -1e+30 }
 0x118   :  { %106 = vmax.xlane.f32.xlu0 %v103_v23 }
 0x17f   :  { %v105_v24 = vpop.xlane.xlu0 %104 }
 0x180   :  { %v108_v25 = vsub.f32 %v102_v20, %v105_v24 }
 0x182   :  { %v110_v26 = vmul.f32 1.442695, %v108_v25 }
 0x184   :  { %189 = vpow2.f32 %v110_v26 }
 0x18a   :  { %v190_v27 = vpop.eup %189 }
 0x18b   :  { %114 = vadd.xlane.f32.xlu1 %v190_v27  ;;  %v107_v28 = vpop.xlane.xlu0 %106 }
 0x18c   :  { %v109_v29 = vsub.f32 %v103_v23, %v107_v28 }
 0x18e   :  { %v112_v30 = vmul.f32 1.442695, %v109_v29 }
 0x190   :  { %191 = vpow2.f32 %v112_v30 }
 0x196   :  { %v192_v31 = vpop.eup %191 }
 0x197   :  { %116 = vadd.xlane.f32.xlu1 %v192_v31 }
 0x1fe   :  { %v115_v32 = vpop.xlane.xlu1 %114 }
 0x1ff   :  { %193 = vrcp.f32 %v115_v32  ;;  %v129_v36 = vand.u32 2147483648, %v115_v32  ;;  %v127_v38 = vand.u32 2147483647, %v115_v32  ;;  %vm123_vm5 = vweird.f32 %v115_v32 }
 0x201   :  { %v130_v41 = vor.u32 1.1754944e-38, %v129_v36  ;;  %vm128_vm7 = vcmp.eq.f32.partialorder %v127_v38, 8.507059e+37 }
 0x205   :  { %v194_v33 = vpop.eup %193 }
 0x206   :  { %v119_v34 = vmul.f32 %v194_v33, %v115_v32  ;;  %vm124_vm4 = vweird.f32 %v194_v33 }
 0x207   :  { %vm125_vm6 = vmor %vm123_vm5, %vm124_vm4 }
 0x208   :  { %v120_v35 = vsub.f32 1.0, %v119_v34 }
 0x20a   :  { %v121_v37 = vmul.f32 %v194_v33, %v120_v35  ;;  %v117_v39 = vpop.xlane.xlu1 %116 }
 0x20b   :  { %195 = vrcp.f32 %v117_v39  ;;  %v144_v49 = vand.u32 2147483648, %v117_v39  ;;  %v142_v51 = vand.u32 2147483647, %v117_v39  ;;  %vm138_vm10 = vweird.f32 %v117_v39 }
 0x20c   :  { %v122_v40 = vadd.f32 %v194_v33, %v121_v37 }
 0x20d   :  { %v145_v53 = vor.u32 1.1754944e-38, %v144_v49  ;;  %vm143_vm12 = vcmp.eq.f32.partialorder %v142_v51, 8.507059e+37 }
 0x20e   :  { %v126_v42 = vsel %vm125_vm6, %v194_v33, %v122_v40 }
 0x20f   :  { %v131_v43 = vsel %vm128_vm7, %v130_v41, %v126_v42 }
 0x210   :  { %v132_v44 = vmul.f32 %v190_v27, %v131_v43 }
 0x211   :  { %v196_v45 = vpop.eup %195 }
 0x212   :  { %v134_v46 = vmul.f32 %v196_v45, %v117_v39  ;;  %v149_v47 = vsel %vm148_vm8, %v94_v19, %v132_v44  ;;  %vm139_vm9 = vweird.f32 %v196_v45 }
 0x213   :  { %151 = vst [vmem:[#allocation2] sm:$0xff] %v149_v47  ;;  %vm140_vm11 = vmor %vm138_vm10, %vm139_vm9 }
 0x214   :  { %v135_v48 = vsub.f32 1.0, %v134_v46 }
 0x216   :  { %v136_v50 = vmul.f32 %v196_v45, %v135_v48 }
 0x218   :  { %v137_v52 = vadd.f32 %v196_v45, %v136_v50 }
 0x21a   :  { %v141_v54 = vsel %vm140_vm11, %v196_v45, %v137_v52 }
 0x21b   :  { %v146_v55 = vsel %vm143_vm12, %v145_v53, %v141_v54 }
 0x21c   :  { %v147_v56 = vmul.f32 %v192_v31, %v146_v55 }
 0x21e   :  { %v150_v57 = vsel %vm148_vm8, %v97_v22, %v147_v56 }
 0x21f   :  { %152 = vst [vmem:[#allocation2 + $0x8] sm:$0xff] %v150_v57 }
 0x220   :  { %165 = dma.vmem_to_hbm [thread:$0]  %s158_s3, 256, %s160_s13, [#allocation3], %s224_s14, %s224_s14, %s225_s15  }
 0x221   :  { %221 = dma.done.wait [#allocation3], 256  }
 0x222   :  { %222 = vsyncadd [#allocation3], 4294967040 }
 0x223   :  { %170 = vsyncpa [#allocation3], 1 }

</bundles_post_ra>
